<compile_context>
chip_gen: v7x
topology: tpu7x:2x2x1
jax: 0.10.0
libtpu: 0.0.40
codegen_flags: <defaults>
</compile_context>

<pallas_src>
import functools

import jax
import jax.numpy as jnp
from jax import lax
from jax.experimental import pallas as pl
from jax.experimental.pallas import tpu as pltpu


_HALO = 3                      # max conv half-width over the merged taps (k=7 -> 3)
_TAPS = 2 * _HALO + 1          # 7 merged taps

# MXU-native operand dtype (f32 accumulation is kept regardless).
_MATMUL_DTYPE = jnp.bfloat16


def _round_up(v, m):
    return (v + m - 1) // m * m


def _gelu_erf(x):
    # Exact-form (erf) GELU, matching nn.GELU(approximate='none').  erf via
    # Abramowitz-Stegun 7.1.26 (|err| <= 1.5e-7); exp + reciprocal go to the
    # EUP slot, everything else is plain VPU arithmetic.
    z = x * 0.7071067811865476
    a = jnp.abs(z)
    t = pl.reciprocal(1.0 + 0.3275911 * a, approx=True)
    poly = t * (0.254829592 + t * (-0.284496736 + t * (1.421413741 +
               t * (-1.453152027 + t * 1.061405429))))
    erf_abs = 1.0 - poly * jnp.exp(-a * a)
    erf = jnp.where(z >= 0.0, erf_abs, -erf_abs)
    return 0.5 * x * (1.0 + erf)


# -------------------------- fused TimesBlock kernel -------------------------

def _times_block_kernel(lpad_ref, wts_ref, x_ref, xe_ref, w1_ref, b1_ref,
                        w2_ref, b2_ref, o_ref, *, top_k):
    """One (batch b, branch i) grid step.

    grid = (B, top_k): batch axis is "parallel"; the branch axis is
    "arbitrary" and accumulates the softmax-weighted branch outputs (plus the
    residual) into the resident f32 output block.
    """
    b = pl.program_id(0)
    i = pl.program_id(1)
    l_pad = lpad_ref[i]                      # wrap-padded length of this branch
    wv = wts_ref[b * top_k + i]              # this batch's softmax weight

    T = x_ref.shape[1]
    L1 = xe_ref.shape[1]                     # T + 2*_HALO rounded up to 8
    xe = xe_ref[0]                           # (L1, C) f32; rows >= T+6 never used
    row = lax.broadcasted_iota(jnp.int32, (L1, 1), 0)

    # ---- InceptionBlock #1 (C -> 2C) as one im2col matmul ------------------
    # Output row r holds conv position p = r - _HALO of the length-l_pad
    # signal; tap j reads x_wrapped[p + j - _HALO] = xe[r + j - 2*_HALO],
    # zeroed outside [0, l_pad) (Conv1d zero padding + the wrap cut-off).
    cols = []
    for j in range(_TAPS):
        shift = 2 * _HALO - j                         # bring xe[r+j-6] to row r
        shifted = xe if shift == 0 else pltpu.roll(xe, shift, axis=0)
        src = row + (j - 2 * _HALO)
        cols.append(jnp.where((src >= 0) & (src < l_pad), shifted, 0.0))
    lhs1 = jnp.concatenate(cols, axis=-1).astype(_MATMUL_DTYPE)     # (L1, 7*C)
    h = jnp.dot(lhs1, w1_ref[...].astype(_MATMUL_DTYPE),
                preferred_element_type=jnp.float32)
    h = _gelu_erf(h + b1_ref[...])
    # Zero conv-1 positions outside [0, l_pad): they act as Conv1d zero padding
    # for the second inception block (masking must follow bias + GELU).
    h = jnp.where((row >= _HALO) & (row < l_pad + _HALO), h, 0.0)

    # ---- InceptionBlock #2 (2C -> C), truncated to the first T steps -------
    cols2 = []
    for j in range(_TAPS):
        shift = (L1 - j) % L1                         # bring h[r+j] to row r
        cols2.append(h if shift == 0 else pltpu.roll(h, shift, axis=0))
    lhs2 = jnp.concatenate(cols2, axis=-1)[:T].astype(_MATMUL_DTYPE)  # (T, 7*2C)
    out = jnp.dot(lhs2, w2_ref[...].astype(_MATMUL_DTYPE),
                  preferred_element_type=jnp.float32) + b2_ref[...]   # (T, C) f32

    # ---- fused combine: softmax-weighted sum over branches + residual ------
    @pl.when(i == 0)
    def _():
        o_ref[0] = x_ref[0]
    o_ref[0] += wv * out


def times_block_forward(x, params, *, seq_len, top_k):
    """TimesBlock.forward: FFT top-k period selection -> per-period wrap pad ->
    Inception(C->2C) -> GELU -> Inception(2C->C) -> truncate to T ->
    softmax-weighted sum over branches + residual."""
    B, T, C = x.shape
    x = x.astype(jnp.float32)

    # Spectrum / top-k / period lengths (XLA on device; no host sync).
    # TODO(synk): rfft + top_k + softmax have no Pallas primitive; kept in XLA.
    xf = jnp.fft.rfft(x, axis=1)
    freqs = jnp.mean(jnp.abs(xf), axis=-1)                     # (B, T//2+1)
    top_vals, top_idx = jax.lax.top_k(freqs, top_k)            # (B, k), desc-sorted
    period = jnp.maximum(1, seq_len // (top_idx[0] + 1)).astype(jnp.int32)   # (k,)
    l_pad = (((T + period - 1) // period) * period).astype(jnp.int32)        # (k,)
    weights = jax.nn.softmax(top_vals.astype(jnp.float32), axis=1).reshape(-1)  # (B*k,)

    # One fixed working window per branch: rows [0, T) are x, rows [T, T+6) the
    # wrap pad x[:, :6, :] (only read while < l_pad); remaining pad rows are
    # never read.  Replaces the previous (B, 2T+12, C) zero-padded HBM copy.
    L1 = _round_up(T + 2 * _HALO, 8)
    xe = jnp.concatenate([x, x], axis=1)
    if xe.shape[1] >= L1:
        xe = xe[:, :L1]
    else:                      # very short sequences: top up (always masked)
        xe = jnp.pad(xe, ((0, 0), (0, L1 - xe.shape[1]), (0, 0)))

    kernel = functools.partial(_times_block_kernel, top_k=top_k)
    return pl.pallas_call(
        kernel,
        out_shape=jax.ShapeDtypeStruct((B, T, C), jnp.float32),
        grid=(B, top_k),
        in_specs=[
            pl.BlockSpec(memory_space=pltpu.MemorySpace.SMEM),        # l_pad   (k,)
            pl.BlockSpec(memory_space=pltpu.MemorySpace.SMEM),        # weights (B*k,)
            pl.BlockSpec((1, T, C), lambda b, i: (b, 0, 0)),          # x (residual)
            pl.BlockSpec((1, L1, C), lambda b, i: (b, 0, 0)),         # xe (conv input)
            pl.BlockSpec((_TAPS * C, 2 * C), lambda b, i: (0, 0)),    # w1 (im2col)
            pl.BlockSpec((1, 2 * C), lambda b, i: (0, 0)),            # b1
            pl.BlockSpec((_TAPS * 2 * C, C), lambda b, i: (0, 0)),    # w2 (im2col)
            pl.BlockSpec((1, C), lambda b, i: (0, 0)),                # b2
        ],
        out_specs=pl.BlockSpec((1, T, C), lambda b, i: (b, 0, 0)),
        compiler_params=pltpu.CompilerParams(
            dimension_semantics=("parallel", "arbitrary"),
            vmem_limit_bytes=32 * 1024 * 1024),
    )(l_pad, weights, x, xe,
      params["w1"], params["b1"], params["w2"], params["b2"])


# ------------------------------ parameter init ------------------------------

def _merge_inception_weights(ws):
    """Zero-pad branch kernels (k = 2,3,5,7, padding k//2) onto a shared 7-tap
    grid, concat along output channels, and flatten to the (7*C_in, C_out)
    im2col layout used by the kernel (row-major over (tap, in_channel))."""
    c_in = ws[0].shape[1]
    padded = []
    for w in ws:
        k = w.shape[0]
        off = _HALO - k // 2             # PyTorch Conv1d(padding=k//2) alignment
        wp = jnp.zeros((_TAPS, c_in, w.shape[2]), w.dtype)
        padded.append(wp.at[off:off + k].set(w))
    merged = jnp.concatenate(padded, axis=-1)           # (7, C_in, C_out)
    return merged.reshape(_TAPS * c_in, merged.shape[-1])


def _init_inception(key, c_in, c_out):
    c_br = c_out // 4
    keys = jax.random.split(key, 5)
    ws = [jax.random.normal(keys[j], (k, c_in, c_br), jnp.float32) /
          jnp.sqrt(float(k * c_in))
          for j, k in enumerate((2, 3, 5, 7))]
    w = _merge_inception_weights(ws).astype(_MATMUL_DTYPE)
    b = jax.random.normal(keys[4], (1, c_out), jnp.float32) * 0.01
    return w, b


def init_times_block_params(key, d_model):
    k1, k2 = jax.random.split(key)
    w1, b1 = _init_inception(k1, d_model, 2 * d_model)
    w2, b2 = _init_inception(k2, 2 * d_model, d_model)
    return {"w1": w1, "b1": b1, "w2": w2, "b2": b2}


# ---------------------------------- main -------------------------------------

if __name__ == "__main__":
    B, seq_len, d_model, top_k = 2, 16, 8, 3

    key = jax.random.PRNGKey(0)
    x_key, p_key = jax.random.split(key)
    x = jax.random.normal(x_key, (B, seq_len, d_model), jnp.float32)
    params = init_times_block_params(p_key, d_model)

    fwd = jax.jit(functools.partial(times_block_forward,
                                    seq_len=seq_len, top_k=top_k))
    y = jax.block_until_ready(fwd(x, params))

    assert y.shape == (B, seq_len, d_model), y.shape
    assert bool(jnp.all(jnp.isfinite(y)))
    print("KERNEL_OK")
</pallas_src>

<mosaic_0001>
module attributes {stable_mosaic.version = 11 : i64} {
  func.func @_times_block_kernel(%arg0: i32, %arg1: i32, %arg2: memref<3xi32, #tpu.memory_space<smem>>, %arg3: memref<6xf32, #tpu.memory_space<smem>>, %arg4: memref<1x16x8xf32, #tpu.memory_space<vmem>>, %arg5: memref<1x24x8xf32, #tpu.memory_space<vmem>>, %arg6: memref<56x16xbf16, #tpu.memory_space<vmem>>, %arg7: memref<1x16xf32, #tpu.memory_space<vmem>>, %arg8: memref<112x8xbf16, #tpu.memory_space<vmem>>, %arg9: memref<1x8xf32, #tpu.memory_space<vmem>>, %arg10: memref<1x16x8xf32, #tpu.memory_space<vmem>>) attributes {dimension_semantics = [#tpu.dimension_semantics<parallel>, #tpu.dimension_semantics<arbitrary>], iteration_bounds = array<i64: 2, 3>, scalar_prefetch = 0 : i64, scratch_operands = 0 : i64, tpu.core_type = #tpu.core_type<tc>, window_params = [{transform_indices = @transform_0, window_bounds = array<i64: 3>}, {transform_indices = @transform_1, window_bounds = array<i64: 6>}, {transform_indices = @transform_2, window_bounds = array<i64: 1, 16, 8>}, {transform_indices = @transform_3, window_bounds = array<i64: 1, 24, 8>}, {pipeline_mode = #tpu.pipeline_mode<synchronous>, transform_indices = @transform_4, window_bounds = array<i64: 56, 16>}, {pipeline_mode = #tpu.pipeline_mode<synchronous>, transform_indices = @transform_5, window_bounds = array<i64: 1, 16>}, {pipeline_mode = #tpu.pipeline_mode<synchronous>, transform_indices = @transform_6, window_bounds = array<i64: 112, 8>}, {pipeline_mode = #tpu.pipeline_mode<synchronous>, transform_indices = @transform_7, window_bounds = array<i64: 1, 8>}, {transform_indices = @transform_8, window_bounds = array<i64: 1, 16, 8>}]} {
    %0 = arith.index_cast %arg1 : i32 to index
    %1 = memref.load %arg2[%0] : memref<3xi32, #tpu.memory_space<smem>>
    %c3_i32 = arith.constant 3 : i32
    %2 = arith.muli %arg0, %c3_i32 : i32
    %3 = arith.addi %2, %arg1 : i32
    %4 = arith.index_cast %3 : i32 to index
    %5 = memref.load %arg3[%4] : memref<6xf32, #tpu.memory_space<smem>>
    %c0 = arith.constant 0 : index
    %c0_0 = arith.constant 0 : index
    %c0_1 = arith.constant 0 : index
    %6 = vector.load %arg5[%c0, %c0_0, %c0_1] : memref<1x24x8xf32, #tpu.memory_space<vmem>>, vector<1x24x8xf32>
    %7 = vector.shape_cast %6 : vector<1x24x8xf32> to vector<24x8xf32>
    %8 = tpu.iota {dimensions = array<i32: 0>} : vector<24x1xi32>
    %c6_i32 = arith.constant 6 : i32
    %9 = tpu.dynamic_rotate %7 by %c6_i32 dim 0 : vector<24x8xf32>, i32 -> vector<24x8xf32>
    %c-6_i32 = arith.constant -6 : i32
    %10 = vector.broadcast %c-6_i32 : i32 to vector<24x1xi32>
    %11 = arith.addi %8, %10 : vector<24x1xi32>
    %c0_i32 = arith.constant 0 : i32
    %12 = vector.broadcast %c0_i32 : i32 to vector<24x1xi32>
    %13 = arith.cmpi sge, %11, %12 : vector<24x1xi32>
    %14 = vector.broadcast %1 : i32 to vector<24x1xi32>
    %15 = arith.cmpi slt, %11, %14 : vector<24x1xi32>
    %16 = arith.andi %13, %15 : vector<24x1xi1>
    %cst = arith.constant 0.000000e+00 : f32
    %17 = vector.shape_cast %16 : vector<24x1xi1> to vector<24x1xi1>
    %18 = vector.broadcast %17 : vector<24x1xi1> to vector<24x8xi1>
    %19 = vector.broadcast %cst : f32 to vector<24x8xf32>
    %20 = arith.select %18, %9, %19 : vector<24x8xi1>, vector<24x8xf32>
    %c5_i32 = arith.constant 5 : i32
    %21 = tpu.dynamic_rotate %7 by %c5_i32 dim 0 : vector<24x8xf32>, i32 -> vector<24x8xf32>
    %c-5_i32 = arith.constant -5 : i32
    %22 = vector.broadcast %c-5_i32 : i32 to vector<24x1xi32>
    %23 = arith.addi %8, %22 : vector<24x1xi32>
    %c0_i32_2 = arith.constant 0 : i32
    %24 = vector.broadcast %c0_i32_2 : i32 to vector<24x1xi32>
    %25 = arith.cmpi sge, %23, %24 : vector<24x1xi32>
    %26 = vector.broadcast %1 : i32 to vector<24x1xi32>
    %27 = arith.cmpi slt, %23, %26 : vector<24x1xi32>
    %28 = arith.andi %25, %27 : vector<24x1xi1>
    %cst_3 = arith.constant 0.000000e+00 : f32
    %29 = vector.shape_cast %28 : vector<24x1xi1> to vector<24x1xi1>
    %30 = vector.broadcast %29 : vector<24x1xi1> to vector<24x8xi1>
    %31 = vector.broadcast %cst_3 : f32 to vector<24x8xf32>
    %32 = arith.select %30, %21, %31 : vector<24x8xi1>, vector<24x8xf32>
    %c4_i32 = arith.constant 4 : i32
    %33 = tpu.dynamic_rotate %7 by %c4_i32 dim 0 : vector<24x8xf32>, i32 -> vector<24x8xf32>
    %c-4_i32 = arith.constant -4 : i32
    %34 = vector.broadcast %c-4_i32 : i32 to vector<24x1xi32>
    %35 = arith.addi %8, %34 : vector<24x1xi32>
    %c0_i32_4 = arith.constant 0 : i32
    %36 = vector.broadcast %c0_i32_4 : i32 to vector<24x1xi32>
    %37 = arith.cmpi sge, %35, %36 : vector<24x1xi32>
    %38 = vector.broadcast %1 : i32 to vector<24x1xi32>
    %39 = arith.cmpi slt, %35, %38 : vector<24x1xi32>
    %40 = arith.andi %37, %39 : vector<24x1xi1>
    %cst_5 = arith.constant 0.000000e+00 : f32
    %41 = vector.shape_cast %40 : vector<24x1xi1> to vector<24x1xi1>
    %42 = vector.broadcast %41 : vector<24x1xi1> to vector<24x8xi1>
    %43 = vector.broadcast %cst_5 : f32 to vector<24x8xf32>
    %44 = arith.select %42, %33, %43 : vector<24x8xi1>, vector<24x8xf32>
    %c3_i32_6 = arith.constant 3 : i32
    %45 = tpu.dynamic_rotate %7 by %c3_i32_6 dim 0 : vector<24x8xf32>, i32 -> vector<24x8xf32>
    %c-3_i32 = arith.constant -3 : i32
    %46 = vector.broadcast %c-3_i32 : i32 to vector<24x1xi32>
    %47 = arith.addi %8, %46 : vector<24x1xi32>
    %c0_i32_7 = arith.constant 0 : i32
    %48 = vector.broadcast %c0_i32_7 : i32 to vector<24x1xi32>
    %49 = arith.cmpi sge, %47, %48 : vector<24x1xi32>
    %50 = vector.broadcast %1 : i32 to vector<24x1xi32>
    %51 = arith.cmpi slt, %47, %50 : vector<24x1xi32>
    %52 = arith.andi %49, %51 : vector<24x1xi1>
    %cst_8 = arith.constant 0.000000e+00 : f32
    %53 = vector.shape_cast %52 : vector<24x1xi1> to vector<24x1xi1>
    %54 = vector.broadcast %53 : vector<24x1xi1> to vector<24x8xi1>
    %55 = vector.broadcast %cst_8 : f32 to vector<24x8xf32>
    %56 = arith.select %54, %45, %55 : vector<24x8xi1>, vector<24x8xf32>
    %c2_i32 = arith.constant 2 : i32
    %57 = tpu.dynamic_rotate %7 by %c2_i32 dim 0 : vector<24x8xf32>, i32 -> vector<24x8xf32>
    %c-2_i32 = arith.constant -2 : i32
    %58 = vector.broadcast %c-2_i32 : i32 to vector<24x1xi32>
    %59 = arith.addi %8, %58 : vector<24x1xi32>
    %c0_i32_9 = arith.constant 0 : i32
    %60 = vector.broadcast %c0_i32_9 : i32 to vector<24x1xi32>
    %61 = arith.cmpi sge, %59, %60 : vector<24x1xi32>
    %62 = vector.broadcast %1 : i32 to vector<24x1xi32>
    %63 = arith.cmpi slt, %59, %62 : vector<24x1xi32>
    %64 = arith.andi %61, %63 : vector<24x1xi1>
    %cst_10 = arith.constant 0.000000e+00 : f32
    %65 = vector.shape_cast %64 : vector<24x1xi1> to vector<24x1xi1>
    %66 = vector.broadcast %65 : vector<24x1xi1> to vector<24x8xi1>
    %67 = vector.broadcast %cst_10 : f32 to vector<24x8xf32>
    %68 = arith.select %66, %57, %67 : vector<24x8xi1>, vector<24x8xf32>
    %c1_i32 = arith.constant 1 : i32
    %69 = tpu.dynamic_rotate %7 by %c1_i32 dim 0 : vector<24x8xf32>, i32 -> vector<24x8xf32>
    %c-1_i32 = arith.constant -1 : i32
    %70 = vector.broadcast %c-1_i32 : i32 to vector<24x1xi32>
    %71 = arith.addi %8, %70 : vector<24x1xi32>
    %c0_i32_11 = arith.constant 0 : i32
    %72 = vector.broadcast %c0_i32_11 : i32 to vector<24x1xi32>
    %73 = arith.cmpi sge, %71, %72 : vector<24x1xi32>
    %74 = vector.broadcast %1 : i32 to vector<24x1xi32>
    %75 = arith.cmpi slt, %71, %74 : vector<24x1xi32>
    %76 = arith.andi %73, %75 : vector<24x1xi1>
    %cst_12 = arith.constant 0.000000e+00 : f32
    %77 = vector.shape_cast %76 : vector<24x1xi1> to vector<24x1xi1>
    %78 = vector.broadcast %77 : vector<24x1xi1> to vector<24x8xi1>
    %79 = vector.broadcast %cst_12 : f32 to vector<24x8xf32>
    %80 = arith.select %78, %69, %79 : vector<24x8xi1>, vector<24x8xf32>
    %c0_i32_13 = arith.constant 0 : i32
    %81 = vector.broadcast %c0_i32_13 : i32 to vector<24x1xi32>
    %82 = arith.addi %8, %81 : vector<24x1xi32>
    %c0_i32_14 = arith.constant 0 : i32
    %83 = vector.broadcast %c0_i32_14 : i32 to vector<24x1xi32>
    %84 = arith.cmpi sge, %82, %83 : vector<24x1xi32>
    %85 = vector.broadcast %1 : i32 to vector<24x1xi32>
    %86 = arith.cmpi slt, %82, %85 : vector<24x1xi32>
    %87 = arith.andi %84, %86 : vector<24x1xi1>
    %cst_15 = arith.constant 0.000000e+00 : f32
    %88 = vector.shape_cast %87 : vector<24x1xi1> to vector<24x1xi1>
    %89 = vector.broadcast %88 : vector<24x1xi1> to vector<24x8xi1>
    %90 = vector.broadcast %cst_15 : f32 to vector<24x8xf32>
    %91 = arith.select %89, %7, %90 : vector<24x8xi1>, vector<24x8xf32>
    %92 = tpu.concatenate %20, %32, %44, %56, %68, %80, %91 in 1 : vector<24x8xf32>, vector<24x8xf32>, vector<24x8xf32>, vector<24x8xf32>, vector<24x8xf32>, vector<24x8xf32>, vector<24x8xf32> -> vector<24x56xf32>
    %93 = arith.truncf %92 : vector<24x56xf32> to vector<24x56xbf16>
    %c0_16 = arith.constant 0 : index
    %c0_17 = arith.constant 0 : index
    %94 = vector.load %arg6[%c0_16, %c0_17] : memref<56x16xbf16, #tpu.memory_space<vmem>>, vector<56x16xbf16>
    %cst_18 = arith.constant dense<0.000000e+00> : vector<24x16xf32>
    %95 = tpu.matmul %93, %94, %cst_18 {dimension_numbers = #tpu.dot_dimension_numbers<[1], [0], [0], [1], [0, 0, 1, 1], [], []>} : vector<24x56xbf16>, vector<56x16xbf16>, vector<24x16xf32> -> vector<24x16xf32>
    %c0_19 = arith.constant 0 : index
    %c0_20 = arith.constant 0 : index
    %96 = vector.load %arg7[%c0_19, %c0_20] : memref<1x16xf32, #tpu.memory_space<vmem>>, vector<1x16xf32>
    %97 = vector.broadcast %96 : vector<1x16xf32> to vector<24x16xf32>
    %98 = arith.addf %95, %97 : vector<24x16xf32>
    %cst_21 = arith.constant 0.707106769 : f32
    %99 = vector.broadcast %cst_21 : f32 to vector<24x16xf32>
    %100 = arith.mulf %98, %99 : vector<24x16xf32>
    %101 = math.absf %100 : vector<24x16xf32>
    %cst_22 = arith.constant 0.327591091 : f32
    %102 = vector.broadcast %cst_22 : f32 to vector<24x16xf32>
    %103 = arith.mulf %102, %101 : vector<24x16xf32>
    %cst_23 = arith.constant 1.000000e+00 : f32
    %104 = vector.broadcast %cst_23 : f32 to vector<24x16xf32>
    %105 = arith.addf %104, %103 : vector<24x16xf32>
    %106 = tpu.reciprocal %105 {approx = true} : vector<24x16xf32> -> vector<24x16xf32>
    %cst_24 = arith.constant 1.06140542 : f32
    %107 = vector.broadcast %cst_24 : f32 to vector<24x16xf32>
    %108 = arith.mulf %106, %107 : vector<24x16xf32>
    %cst_25 = arith.constant -1.45315206 : f32
    %109 = vector.broadcast %cst_25 : f32 to vector<24x16xf32>
    %110 = arith.addf %109, %108 : vector<24x16xf32>
    %111 = arith.mulf %106, %110 : vector<24x16xf32>
    %cst_26 = arith.constant 1.42141378 : f32
    %112 = vector.broadcast %cst_26 : f32 to vector<24x16xf32>
    %113 = arith.addf %112, %111 : vector<24x16xf32>
    %114 = arith.mulf %106, %113 : vector<24x16xf32>
    %cst_27 = arith.constant -0.284496725 : f32
    %115 = vector.broadcast %cst_27 : f32 to vector<24x16xf32>
    %116 = arith.addf %115, %114 : vector<24x16xf32>
    %117 = arith.mulf %106, %116 : vector<24x16xf32>
    %cst_28 = arith.constant 0.254829586 : f32
    %118 = vector.broadcast %cst_28 : f32 to vector<24x16xf32>
    %119 = arith.addf %118, %117 : vector<24x16xf32>
    %120 = arith.mulf %106, %119 : vector<24x16xf32>
    %cst_29 = arith.constant 0.000000e+00 : f32
    %121 = vector.broadcast %cst_29 : f32 to vector<24x16xf32>
    %122 = arith.subf %121, %101 : vector<24x16xf32>
    %123 = arith.mulf %122, %101 : vector<24x16xf32>
    %124 = math.exp %123 : vector<24x16xf32>
    %125 = arith.mulf %120, %124 : vector<24x16xf32>
    %cst_30 = arith.constant 1.000000e+00 : f32
    %126 = vector.broadcast %cst_30 : f32 to vector<24x16xf32>
    %127 = arith.subf %126, %125 : vector<24x16xf32>
    %cst_31 = arith.constant 0.000000e+00 : f32
    %128 = vector.broadcast %cst_31 : f32 to vector<24x16xf32>
    %129 = arith.cmpf oge, %100, %128 : vector<24x16xf32>
    %cst_32 = arith.constant 0.000000e+00 : f32
    %130 = vector.broadcast %cst_32 : f32 to vector<24x16xf32>
    %131 = arith.subf %130, %127 : vector<24x16xf32>
    %132 = arith.select %129, %127, %131 : vector<24x16xi1>, vector<24x16xf32>
    %cst_33 = arith.constant 5.000000e-01 : f32
    %133 = vector.broadcast %cst_33 : f32 to vector<24x16xf32>
    %134 = arith.mulf %133, %98 : vector<24x16xf32>
    %cst_34 = arith.constant 1.000000e+00 : f32
    %135 = vector.broadcast %cst_34 : f32 to vector<24x16xf32>
    %136 = arith.addf %135, %132 : vector<24x16xf32>
    %137 = arith.mulf %134, %136 : vector<24x16xf32>
    %c3_i32_35 = arith.constant 3 : i32
    %138 = vector.broadcast %c3_i32_35 : i32 to vector<24x1xi32>
    %139 = arith.cmpi sge, %8, %138 : vector<24x1xi32>
    %c3_i32_36 = arith.constant 3 : i32
    %140 = arith.addi %1, %c3_i32_36 : i32
    %141 = vector.broadcast %140 : i32 to vector<24x1xi32>
    %142 = arith.cmpi slt, %8, %141 : vector<24x1xi32>
    %143 = arith.andi %139, %142 : vector<24x1xi1>
    %cst_37 = arith.constant 0.000000e+00 : f32
    %144 = vector.shape_cast %143 : vector<24x1xi1> to vector<24x1xi1>
    %145 = vector.broadcast %144 : vector<24x1xi1> to vector<24x16xi1>
    %146 = vector.broadcast %cst_37 : f32 to vector<24x16xf32>
    %147 = arith.select %145, %137, %146 : vector<24x16xi1>, vector<24x16xf32>
    %c23_i32 = arith.constant 23 : i32
    %148 = tpu.dynamic_rotate %147 by %c23_i32 dim 0 : vector<24x16xf32>, i32 -> vector<24x16xf32>
    %c22_i32 = arith.constant 22 : i32
    %149 = tpu.dynamic_rotate %147 by %c22_i32 dim 0 : vector<24x16xf32>, i32 -> vector<24x16xf32>
    %c21_i32 = arith.constant 21 : i32
    %150 = tpu.dynamic_rotate %147 by %c21_i32 dim 0 : vector<24x16xf32>, i32 -> vector<24x16xf32>
    %c20_i32 = arith.constant 20 : i32
    %151 = tpu.dynamic_rotate %147 by %c20_i32 dim 0 : vector<24x16xf32>, i32 -> vector<24x16xf32>
    %c19_i32 = arith.constant 19 : i32
    %152 = tpu.dynamic_rotate %147 by %c19_i32 dim 0 : vector<24x16xf32>, i32 -> vector<24x16xf32>
    %c18_i32 = arith.constant 18 : i32
    %153 = tpu.dynamic_rotate %147 by %c18_i32 dim 0 : vector<24x16xf32>, i32 -> vector<24x16xf32>
    %154 = tpu.concatenate %147, %148, %149, %150, %151, %152, %153 in 1 : vector<24x16xf32>, vector<24x16xf32>, vector<24x16xf32>, vector<24x16xf32>, vector<24x16xf32>, vector<24x16xf32>, vector<24x16xf32> -> vector<24x112xf32>
    %155 = vector.extract_strided_slice %154 {offsets = [0, 0], sizes = [16, 112], strides = [1, 1]} : vector<24x112xf32> to vector<16x112xf32>
    %156 = arith.truncf %155 : vector<16x112xf32> to vector<16x112xbf16>
    %c0_38 = arith.constant 0 : index
    %c0_39 = arith.constant 0 : index
    %157 = vector.load %arg8[%c0_38, %c0_39] : memref<112x8xbf16, #tpu.memory_space<vmem>>, vector<112x8xbf16>
    %cst_40 = arith.constant dense<0.000000e+00> : vector<16x8xf32>
    %158 = tpu.matmul %156, %157, %cst_40 {dimension_numbers = #tpu.dot_dimension_numbers<[1], [0], [0], [1], [0, 0, 1, 1], [], []>} : vector<16x112xbf16>, vector<112x8xbf16>, vector<16x8xf32> -> vector<16x8xf32>
    %c0_41 = arith.constant 0 : index
    %c0_42 = arith.constant 0 : index
    %159 = vector.load %arg9[%c0_41, %c0_42] : memref<1x8xf32, #tpu.memory_space<vmem>>, vector<1x8xf32>
    %160 = vector.broadcast %159 : vector<1x8xf32> to vector<16x8xf32>
    %161 = arith.addf %158, %160 : vector<16x8xf32>
    %c0_i32_43 = arith.constant 0 : i32
    %162 = arith.cmpi eq, %arg1, %c0_i32_43 : i32
    %163 = arith.extui %162 : i1 to i32
    %c0_i32_44 = arith.constant 0 : i32
    %164 = arith.cmpi ne, %163, %c0_i32_44 : i32
    scf.if %164 {
      %c0_51 = arith.constant 0 : index
      %c0_52 = arith.constant 0 : index
      %c0_53 = arith.constant 0 : index
      %173 = vector.load %arg4[%c0_51, %c0_52, %c0_53] : memref<1x16x8xf32, #tpu.memory_space<vmem>>, vector<1x16x8xf32>
      %174 = vector.shape_cast %173 : vector<1x16x8xf32> to vector<16x8xf32>
      %c0_54 = arith.constant 0 : index
      %c0_55 = arith.constant 0 : index
      %c0_56 = arith.constant 0 : index
      %175 = vector.load %arg10[%c0_54, %c0_55, %c0_56] : memref<1x16x8xf32, #tpu.memory_space<vmem>>, vector<1x16x8xf32>
      %176 = vector.shape_cast %175 : vector<1x16x8xf32> to vector<16x8xf32>
      %177 = vector.shape_cast %174 : vector<16x8xf32> to vector<1x16x8xf32>
      tpu.vector_store %arg10[%c0_54, %c0_55, %c0_56], %177 {strides = array<i32>} : memref<1x16x8xf32, #tpu.memory_space<vmem>>, vector<1x16x8xf32>,
    } else {
    }
    %c0_45 = arith.constant 0 : index
    %c0_46 = arith.constant 0 : index
    %c0_47 = arith.constant 0 : index
    %165 = vector.load %arg10[%c0_45, %c0_46, %c0_47] : memref<1x16x8xf32, #tpu.memory_space<vmem>>, vector<1x16x8xf32>
    %166 = vector.shape_cast %165 : vector<1x16x8xf32> to vector<16x8xf32>
    %167 = vector.broadcast %5 : f32 to vector<16x8xf32>
    %168 = arith.mulf %167, %161 : vector<16x8xf32>
    %169 = arith.addf %166, %168 : vector<16x8xf32>
    %c0_48 = arith.constant 0 : index
    %c0_49 = arith.constant 0 : index
    %c0_50 = arith.constant 0 : index
    %170 = vector.load %arg10[%c0_48, %c0_49, %c0_50] : memref<1x16x8xf32, #tpu.memory_space<vmem>>, vector<1x16x8xf32>
    %171 = vector.shape_cast %170 : vector<1x16x8xf32> to vector<16x8xf32>
    %172 = vector.shape_cast %169 : vector<16x8xf32> to vector<1x16x8xf32>
    tpu.vector_store %arg10[%c0_48, %c0_49, %c0_50], %172 {strides = array<i32>} : memref<1x16x8xf32, #tpu.memory_space<vmem>>, vector<1x16x8xf32>,
    return
  }
  func.func @transform_0(%arg0: i32, %arg1: i32) -> i32 {
    %c0_i32 = arith.constant 0 : i32
    %c0_i32_0 = arith.constant 0 : i32
    return %c0_i32 : i32
  }
  func.func @transform_1(%arg0: i32, %arg1: i32) -> i32 {
    %c0_i32 = arith.constant 0 : i32
    %c0_i32_0 = arith.constant 0 : i32
    return %c0_i32 : i32
  }
  func.func @transform_2(%arg0: i32, %arg1: i32) -> (i32, i32, i32) {
    %c0_i32 = arith.constant 0 : i32
    %c0_i32_0 = arith.constant 0 : i32
    %c0_i32_1 = arith.constant 0 : i32
    return %arg0, %c0_i32, %c0_i32_0 : i32, i32, i32
  }
  func.func @transform_3(%arg0: i32, %arg1: i32) -> (i32, i32, i32) {
    %c0_i32 = arith.constant 0 : i32
    %c0_i32_0 = arith.constant 0 : i32
    %c0_i32_1 = arith.constant 0 : i32
    return %arg0, %c0_i32, %c0_i32_0 : i32, i32, i32
  }
  func.func @transform_4(%arg0: i32, %arg1: i32) -> (i32, i32) {
    %c0_i32 = arith.constant 0 : i32
    %c0_i32_0 = arith.constant 0 : i32
    %c0_i32_1 = arith.constant 0 : i32
    return %c0_i32, %c0_i32_0 : i32, i32
  }
  func.func @transform_5(%arg0: i32, %arg1: i32) -> (i32, i32) {
    %c0_i32 = arith.constant 0 : i32
    %c0_i32_0 = arith.constant 0 : i32
    %c0_i32_1 = arith.constant 0 : i32
    return %c0_i32, %c0_i32_0 : i32, i32
  }
  func.func @transform_6(%arg0: i32, %arg1: i32) -> (i32, i32) {
    %c0_i32 = arith.constant 0 : i32
    %c0_i32_0 = arith.constant 0 : i32
    %c0_i32_1 = arith.constant 0 : i32
    return %c0_i32, %c0_i32_0 : i32, i32
  }
  func.func @transform_7(%arg0: i32, %arg1: i32) -> (i32, i32) {
    %c0_i32 = arith.constant 0 : i32
    %c0_i32_0 = arith.constant 0 : i32
    %c0_i32_1 = arith.constant 0 : i32
    return %c0_i32, %c0_i32_0 : i32, i32
  }
  func.func @transform_8(%arg0: i32, %arg1: i32) -> (i32, i32, i32) {
    %c0_i32 = arith.constant 0 : i32
    %c0_i32_0 = arith.constant 0 : i32
    %c0_i32_1 = arith.constant 0 : i32
    return %arg0, %c0_i32, %c0_i32_0 : i32, i32, i32
  }
}

</mosaic_0001>

<bundles_post_ra>
// kernel: times_block_forward.1
= control target key start
LH: loop header
LB: loop body
LE: loop exit
PB: predicated region body
PF: predicated region fallthrough
CT: control target
= control target key end

     0   :  { %13 = vsyncpa [#allocation3], 0  ;;  %s1949_s0 = inlined_call_operand.vmem [shape: s32[3], index: 0, kind: input, shape index: {}]   ;;  %s1950_s1 = inlined_call_operand.vmem [shape: f32[6], index: 1, kind: input, shape index: {}]   ;;  %s1951_s2 = inlined_call_operand.vmem [shape: f32[2,16,8], index: 2, kind: input, shape index: {}]   ;;  %s1952_s3 = inlined_call_operand.vmem [shape: f32[2,24,8], index: 3, kind: input, shape index: {}]   ;;  %s1953_s4 = inlined_call_operand.vmem [shape: bf16[56,16], index: 4, kind: input, shape index: {}]   ;;  %s1954_s5 = inlined_call_operand.vmem [shape: f32[1,16], index: 5, kind: input, shape index: {}]   ;;  %s1955_s6 = inlined_call_operand.vmem [shape: bf16[112,8], index: 6, kind: input, shape index: {}]   ;;  %s1956_s7 = inlined_call_operand.vmem [shape: f32[1,8], index: 7, kind: input, shape index: {}]   ;;  %s1957_s8 = inlined_call_operand.vmem [shape: f32[2,16,8], index: 8, kind: output, shape index: {}]  }
   0x1   :  { %14 = vsyncpa [#allocation5], 0  ;;  %s1547_s27 = smov 0   ;;  %s1549_s28 = smov 0  }
   0x2   :  { %s1551_s29 = smov 0   ;;  %s1553_s30 = smov 0  }
   0x3   :  { %s1555_s9 = smov 0  }
   0x4 LB: > { %s1175_s10 = sadd.s32 4294967295, %s1487_s9   ;;  %s29_s11 = sadd.s32 1, %s1479_s29  ;;  %s1487_s9 = sphi %s1555_s9, %s20_s9   ;;  %s1483_s30 = sphi %s1553_s30, %s1973_s30   ;;  %s1479_s29 = sphi %s1551_s29, %s1972_s29   ;;  %s1475_s28 = sphi %s1549_s28, %s1971_s28   ;;  %s1471_s27 = sphi %s1547_s27, %s1970_s27  }
   0x5   : > { %p30_p0 = scmp.ge.s32.totalorder %s29_s11, 3  ;;  %s32_s12 = sadd.s32 1, %s1483_s30 }
   0x6   : > { %p1177_p1 = scmp.ge.s32.totalorder %s1487_s9, 1  ;;  %p241_p2 = scmp.lt.s32.totalorder %s1487_s9, 7 }
   0x7   : > { %s1975_s11 = smov (%p30_p0, %s29_s11), 0  ;;  %s1977_s12 = smov (!%p30_p0, %s32_s12), %s1483_s30 }
   0x8   : > { %p1580_p3 = pnand %p1177_p1, %p241_p2  ;;  %p34_p4 = scmp.ge.s32.totalorder %s1977_s12, 2 }
   0x9   : > { %p1584_p5 = scmp.eq.s32.totalorder %s1175_s10, 0  ;;  %s254_s17 = sshll.u32 %s1949_s0, 4  ;;  %s255_s17 = int_to_ptr.vmem [resolvable:$true] %s254_s17 }
   0xa   : > { %s1961_s13 = scalar_select %p1580_p3, 1, 0 }
   0xb   : > { %s1962_s14 = scalar_select %p1584_p5, 1, 0 }
   0xc   : > { %p1264_p6 = pneg %p1580_p3  ;;  %s1979_s12 = smov (%p34_p4, %s1977_s12), 0 }
   0xd   : > { %s265_s21 = sshll.u32 %s1950_s1, 4  ;;  %s1411_s22 = scalar_lea.vmem %s255_s17, 16  ;;  %s266_s21 = int_to_ptr.vmem [resolvable:$true] %s265_s21 }
   0xe   : > { %p1597_p7 = pnand %p1584_p5, %p1264_p6  ;;  %p1412_p8 = scmp.ne.s32.totalorder %s255_s17, %s1411_s22 }
   0xf   : > { %p1419_p12 = scmp.lt.s32.totalorder %s255_s17, %s255_s17  ;;  %p1420_p13 = scmp.lt.s32.totalorder %s1411_s22, %s1411_s22 }
  0x10   : > { %p1413_p9 = pneg %p1597_p7 }
  0x11   : > { %p1421_p0 = por %p1420_p13, %p1419_p12 }
  0x12   : > { %p1414_p10 = pnand %p1413_p9, %p1412_p8 }
  0x14   : > { %p1415_p11 = pneg %p1414_p10 }
  0x16   : > { %p1422_p1 = pnand %p1421_p0, %p1415_p11 }
  0x18   : > { %1425 = shalt.err (!%p1422_p1)
}
  0x19   : > { %s1489_s23 = smov [#allocation2]   ;;  %s1426_s24 = scalar_lea.vmem %s266_s21, 16 }
  0x1a   : > { %1267 = dma.vmem_to_smem (!%p1597_p7), %s255_s17, 16, %s1489_s23, [#allocation3]  }
  0x1b   : > { %p1427_p2 = scmp.ne.s32.totalorder %s266_s21, %s1426_s24  ;;  %p1434_p5 = scmp.lt.s32.totalorder %s266_s21, %s266_s21 }
  0x1c   : > { %p1435_p3 = scmp.lt.s32.totalorder %s1426_s24, %s1426_s24 }
  0x1d   : > { %p1429_p4 = pnand %p1427_p2, %p1413_p9 }
  0x1e   : > { %p1436_p8 = por %p1435_p3, %p1434_p5 }
  0x1f   : > { %p1430_p6 = pneg %p1429_p4 }
  0x21   : > { %p1437_p10 = pnand %p1436_p8, %p1430_p6 }
  0x23   : > { %1440 = shalt.err (!%p1437_p10)
}
  0x24   : > { %s1490_s25 = smov [#allocation4]   ;;  %p1964_p11 = scmp.ne.s32.totalorder %s1961_s13, 0 }
  0x25   : > { %1270 = dma.vmem_to_smem (!%p1597_p7), %s266_s21, 16, %s1490_s25, [#allocation5]  }
  0x26   : > { %306 = sbr.rel (%p1964_p11) target bundleno = 827 (0x33b), region = 52  ;;  %p1965_p12 = scmp.ne.s32.totalorder (!%p1964_p11), %s1962_s14, 0 }
  0x2d   : > { %1462 = dma.done.wait (%p1965_p12), [#allocation3], 16  }
  0x2e   : > { %1464 = vsyncadd (%p1965_p12), [#allocation3], 4294967280 }
  0x2f   : > { %1466 = dma.done.wait (%p1965_p12), [#allocation5], 16  }
  0x30   : > { %1468 = vsyncadd (%p1965_p12), [#allocation5], 4294967280 }
  0x31   : > { %316 = sfence }
  0x32   : > { %p350_p3 = scmp.lt.s32.totalorder %s1475_s28, 1  ;;  %s1622_s26 = sld [smem:[#allocation2 + %s1471_s27]]  ;;  %v373_v0 = vlaneseq  ;;  %v1388_v24 = vld [vmem:[%s1953_s4] sm:$0xff]   ;;  %v1389_v41 = vld [vmem:[%s1953_s4 + $0x8] sm:$0xff]   ;;  %v1390_v52 = vld [vmem:[%s1953_s4 + $0x10] sm:$0xff]  }
  0x33   : > { %1224 = vmatprep.subr.bf16.mxu0 %v1388_v24  ;;  %s1492_s16 = smov 8   ;;  %s1493_s22 = smov 24  }
  0x34   : > { %s351_s10 = scalar_select %p350_p3, %s1475_s28, 1  ;;  %v1625_v1 = vshrl.u32 %v373_v0, 7  ;;  %1225 = vmatpush3.bf16.msra.mxu0 %v1388_v24 }
  0x35   : > { %1226 = vmatprep.subr.bf16.mxu0 %v1389_v41  ;;  %s1495_s24 = smov 40   ;;  %s1501_s25 = smov 80  }
  0x36   : > { %s1255_s13 = smul.u32 24, %s351_s10  ;;  %v1628_v2 = vadd.s32 8, %v1625_v1  ;;  %vm437_vm0 = vcmp.lt.s32.totalorder %v1625_v1, 4  ;;  %v441_v3 = vadd.s32 4294967292, %v1625_v1  ;;  %s1208_s14 = sshll.u32 %s351_s10, 4  ;;  %vm409_vm1 = vcmp.lt.s32.totalorder %v1625_v1, 5 }
  0x37   : > { %s1636_s17 = scalar_lea.vmem %s1951_s2, %s1208_s14  ;;  %s1641_s20 = scalar_lea.vmem %s1957_s8, %s1208_s14  ;;  %v413_v4 = vadd.s32 4294967291, %v1625_v1  ;;  %v1645_v5 = vadd.s32 16, %v1625_v1  ;;  %vm465_vm2 = vcmp.lt.s32.totalorder %v1625_v1, 3  ;;  %v1649_v6 = vadd.s32 4294967293, %v1625_v1 }
  0x38   : > { %s359_s23 = scalar_lea.vmem %s1952_s3, %s1255_s13  ;;  %v1655_v7 = vstv %s1622_s26  ;;  %v442_v8 = vadd.s32 4294967292, %v1628_v2  ;;  %vm444_vm3 = vcmp.ge.s32.totalorder %v441_v3, 0  ;;  %v414_v9 = vadd.s32 4294967291, %v1628_v2  ;;  %s367_s10 = smul.u32 3, %s1475_s28  ;;  %1227 = vmatpush3.bf16.msra.mxu0 %v1389_v41 }
  0x39   : > { %v1659_v10 = vld [vmem:[%s359_s23] sm:$0xff]  ;;  %v1661_v11 = vld [vmem:[%s359_s23 + $0x8] sm:$0xff]  ;;  %v1663_v12 = vld [vmem:[%s359_s23 + $0x10] sm:$0xff]  ;;  %vm447_vm4 = vcmp.lt.s32.totalorder %v441_v3, %v1655_v7  ;;  %vm416_vm5 = vcmp.ge.s32.totalorder %v413_v4, 0  ;;  %vm419_vm6 = vcmp.lt.s32.totalorder %v413_v4, %v1655_v7  ;;  %v443_v13 = vadd.s32 4294967292, %v1645_v5  ;;  %s1491_s13 = smov 16   ;;  %1228 = vmatprep.subr.bf16.mxu0 %v1390_v52 }
  0x3a   : > { %v434_v14 = vrot.slane %v1659_v10, 4  ;;  %v435_v15 = vrot.slane %v1661_v11, 4  ;;  %v436_v16 = vrot.slane %v1663_v12, 4  ;;  %vm448_vm7 = vcmp.lt.s32.totalorder %v442_v8, %v1655_v7  ;;  %vm450_vm8 = vmand %vm444_vm3, %vm447_vm4  ;;  %s368_s28 = sadd.s32 %s1471_s27, %s367_s10  ;;  %s1494_s23 = smov 32  }
  0x3b   : > { %v406_v17 = vrot.slane %v1659_v10, 3  ;;  %v407_v18 = vrot.slane %v1661_v11, 3  ;;  %v408_v19 = vrot.slane %v1663_v12, 3  ;;  %vm420_vm9 = vcmp.lt.s32.totalorder %v414_v9, %v1655_v7  ;;  %vm1676_vm10 = vmand %vm416_vm5, %vm419_vm6  ;;  %s1715_s18 = sld [smem:[#allocation4 + %s368_s28]]  ;;  %s1496_s28 = smov 48  }
  0x3c   : > { %v439_v21 = vsel %vm437_vm0, %v434_v14, %v435_v15  ;;  %v440_v22 = vsel %vm437_vm0, %v436_v16, %v434_v14  ;;  %v438_v23 = vsel %vm437_vm0, %v435_v15, %v436_v16  ;;  %vm449_vm11 = vcmp.lt.s32.totalorder %v443_v13, %v1655_v7  ;;  %1229 = vmatpush3.bf16.msra.mxu0 %v1390_v52  ;;  %s837_s15 = sadd.s32 3, %s1622_s26  ;;  %p1205_p5 = scmp.ne.s32.totalorder %s1471_s27, 0 }
  0x3d   : > { %v459_v25 = vsel %vm450_vm8, %v440_v22, 0.0  ;;  %v460_v26 = vsel %vm448_vm7, %v439_v21, 0.0  ;;  %v411_v27 = vsel %vm409_vm1, %v406_v17, %v407_v18  ;;  %v412_v28 = vsel %vm409_vm1, %v408_v19, %v406_v17 }
  0x3e   : > { %v1333_v29 = vpack.i.bf16 %v460_v26, %v459_v25  ;;  %v431_v30 = vsel %vm1676_vm10, %v412_v28, 0.0  ;;  %v432_v31 = vsel %vm420_vm9, %v411_v27, 0.0  ;;  %v461_v32 = vsel %vm449_vm11, %v438_v23, 0.0 }
  0x3f   : > { %v1328_v33 = vpack.i.bf16 %v432_v31, %v431_v30  ;;  %v410_v34 = vsel %vm409_vm1, %v407_v18, %v408_v19  ;;  %v415_v35 = vadd.s32 4294967291, %v1645_v5  ;;  %v463_v36 = vrot.slane %v1661_v11, 5  ;;  %v1391_v30 = vld [vmem:[%s1953_s4 + $0x18] ss:$0 sps:$4 sm:$0xff]  }
  0x40   : > { %1334 = vrot.lane.b32.xlu1 %v1333_v29, %s1491_s13  ;;  %v464_v37 = vrot.slane %v1663_v12, 5  ;;  %v471_v38 = vadd.s32 4294967293, %v1645_v5  ;;  %v462_v39 = vrot.slane %v1659_v10, 5  ;;  %v470_v40 = vadd.s32 4294967293, %v1628_v2 }
  0x41   : > { %1329 = vrot.lane.b32.xlu0 %v1328_v33, %s1492_s16  ;;  %vm421_vm12 = vcmp.lt.s32.totalorder %v415_v35, %v1655_v7  ;;  %vm472_vm13 = vcmp.ge.s32.totalorder %v1649_v6, 0  ;;  %vm475_vm14 = vcmp.lt.s32.totalorder %v1649_v6, %v1655_v7  ;;  %v491_v42 = vrot.slane %v1661_v11, 6 }
  0x42   : > { %v433_v43 = vsel %vm421_vm12, %v410_v34, 0.0  ;;  %v466_v44 = vsel %vm465_vm2, %v463_v36, %v464_v37  ;;  %vm477_vm15 = vcmp.lt.s32.totalorder %v471_v38, %v1655_v7  ;;  %v467_v45 = vsel %vm465_vm2, %v462_v39, %v463_v36  ;;  %vm478_vm3 = vmand %vm472_vm13, %vm475_vm14 }
  0x43   : > { %v489_v46 = vsel %vm477_vm15, %v466_v44, 0.0  ;;  %v468_v47 = vsel %vm465_vm2, %v464_v37, %v462_v39  ;;  %vm476_vm4 = vcmp.lt.s32.totalorder %v470_v40, %v1655_v7  ;;  %v492_v48 = vrot.slane %v1663_v12, 6 }
  0x44   : > { %583 = vrot.lane.b32.xlu1 %v461_v32, %s1491_s13  ;;  %v487_v49 = vsel %vm478_vm3, %v468_v47, 0.0  ;;  %v488_v50 = vsel %vm476_vm4, %v467_v45, 0.0  ;;  %vm493_vm5 = vcmp.lt.s32.totalorder %v1625_v1, 2  ;;  %v499_v51 = vadd.s32 4294967294, %v1645_v5 }
  0x45   : > { %571 = vrot.lane.b32.xlu0 %v433_v43, %s1492_s16  ;;  %v1338_v53 = vpack.i.bf16 %v488_v50, %v487_v49  ;;  %v494_v54 = vsel %vm493_vm5, %v491_v42, %v492_v48  ;;  %v490_v55 = vrot.slane %v1659_v10, 6  ;;  %v497_v56 = vadd.s32 4294967294, %v1625_v1 }
  0x46   : > { %vm505_vm6 = vcmp.lt.s32.totalorder %v499_v51, %v1655_v7  ;;  %v498_v57 = vadd.s32 4294967294, %v1628_v2  ;;  %v519_v58 = vrot.slane %v1661_v11, 7  ;;  %v520_v59 = vrot.slane %v1663_v12, 7 }
  0x47   : > { %v517_v60 = vsel %vm505_vm6, %v494_v54, 0.0  ;;  %v495_v61 = vsel %vm493_vm5, %v490_v55, %v491_v42  ;;  %v496_v62 = vsel %vm493_vm5, %v492_v48, %v490_v55  ;;  %vm500_vm7 = vcmp.ge.s32.totalorder %v497_v56, 0 }
  0x48   : > { %595 = vrot.lane.b32.xlu1 %v489_v46, %s1493_s22  ;;  %vm503_vm8 = vcmp.lt.s32.totalorder %v497_v56, %v1655_v7  ;;  %vm504_vm9 = vcmp.lt.s32.totalorder %v498_v57, %v1655_v7  ;;  %vm521_vm10 = vcmp.lt.s32.totalorder %v1625_v1, 1  ;;  %v527_v63 = vadd.s32 4294967295, %v1645_v5 }
  0x49   : > { %1339 = vrot.lane.b32.xlu0 %v1338_v53, %s1493_s22  ;;  %vm506_vm11 = vmand %vm500_vm7, %vm503_vm8  ;;  %v516_v0 = vsel %vm504_vm9, %v495_v61, 0.0  ;;  %v522_v3 = vsel %vm521_vm10, %v519_v58, %v520_v59  ;;  %v518_v4 = vrot.slane %v1659_v10, 7  ;;  %v525_v6 = vadd.s32 4294967295, %v1625_v1 }
  0x4a   : > { %v515_v8 = vsel %vm506_vm11, %v496_v62, 0.0  ;;  %vm533_vm12 = vcmp.lt.s32.totalorder %v527_v63, %v1655_v7  ;;  %v526_v9 = vadd.s32 4294967295, %v1628_v2  ;;  %vm551_vm13 = vcmp.lt.s32.totalorder %v1645_v5, %v1655_v7 }
  0x4b   : > { %v1343_v13 = vpack.i.bf16 %v516_v0, %v515_v8  ;;  %v523_v14 = vsel %vm521_vm10, %v518_v4, %v519_v58  ;;  %v524_v15 = vsel %vm521_vm10, %v520_v59, %v518_v4  ;;  %v545_v16 = vsel %vm533_vm12, %v522_v3, 0.0 }
  0x4c   : > { %607 = vrot.lane.b32.xlu1 %v517_v60, %s1494_s23  ;;  %vm528_vm14 = vcmp.ge.s32.totalorder %v525_v6, 0  ;;  %vm531_vm15 = vcmp.lt.s32.totalorder %v525_v6, %v1655_v7  ;;  %vm532_vm3 = vcmp.lt.s32.totalorder %v526_v9, %v1655_v7  ;;  %vm549_vm6 = vcmp.lt.s32.totalorder %v1625_v1, %v1655_v7 }
  0x4d   : > { %1344 = vrot.lane.b32.xlu0 %v1343_v13, %s1494_s23  ;;  %vm534_vm4 = vmand %vm528_vm14, %vm531_vm15  ;;  %v544_v17 = vsel %vm532_vm3, %v523_v14, 0.0  ;;  %vm550_vm7 = vcmp.lt.s32.totalorder %v1628_v2, %v1655_v7  ;;  %v378_v18 = vrot.slane %v1661_v11, 2  ;;  %v561_v20 = vsel %vm549_vm6, %v1659_v10, 0.0 }
  0x4e   : > { %v543_v19 = vsel %vm534_vm4, %v524_v15, 0.0  ;;  %v562_v21 = vsel %vm550_vm7, %v1661_v11, 0.0  ;;  %v379_v22 = vrot.slane %v1663_v12, 2  ;;  %vm380_vm8 = vcmp.lt.s32.totalorder %v1625_v1, 6 }
  0x4f   : > { %v1348_v23 = vpack.i.bf16 %v544_v17, %v543_v19  ;;  %v384_v24 = vadd.s32 4294967290, %v1625_v1  ;;  %v385_v26 = vadd.s32 4294967290, %v1628_v2  ;;  %v386_v27 = vadd.s32 4294967290, %v1645_v5 }
  0x50   : > { %619 = vrot.lane.b32.xlu1 %v545_v16, %s1495_s24  ;;  %v381_v25 = vsel %vm380_vm8, %v378_v18, %v379_v22  ;;  %v377_v28 = vrot.slane %v1659_v10, 2  ;;  %v563_v11 = vsel %vm551_vm13, %v1663_v12, 0.0  ;;  %v1353_v29 = vpack.i.bf16 %v562_v21, %v561_v20 }
  0x51   : > { %1349 = vrot.lane.b32.xlu0 %v1348_v23, %s1495_s24  ;;  %vm387_vm9 = vcmp.ge.s32.totalorder %v384_v24, 0  ;;  %vm391_vm10 = vcmp.lt.s32.totalorder %v384_v24, %v1655_v7  ;;  %vm392_vm11 = vcmp.lt.s32.totalorder %v385_v26, %v1655_v7  ;;  %vm393_vm12 = vcmp.lt.s32.totalorder %v386_v27, %v1655_v7  ;;  %v1393_v24 = vld [vmem:[%s1955_s6 + $0x8] sm:$0xff]   ;;  %v1395_v26 = vld [vmem:[%s1955_s6 + $0x18] sm:$0xff]   ;;  %v1189_v27 = vld [vmem:[%s1954_s5] ss:$0 sm:$0xff] }
  0x52   : > { %vm1783_vm14 = vmand %vm387_vm9, %vm391_vm10  ;;  %v382_v31 = vsel %vm380_vm8, %v377_v28, %v378_v18  ;;  %v383_v12 = vsel %vm380_vm8, %v379_v22, %v377_v28  ;;  %v405_v32 = vsel %vm393_vm12, %v381_v25, 0.0  ;;  %vm704_vm13 = vcmask 1043456   ;;  %v1392_v22 = vld [vmem:[%s1955_s6] sm:$0xff]   ;;  %v1394_v25 = vld [vmem:[%s1955_s6 + $0x10] sm:$0xff]  }
  0x53   : > { %v403_v33 = vsel %vm1783_vm14, %v383_v12, 0.0  ;;  %v404_v34 = vsel %vm392_vm11, %v382_v31, 0.0  ;;  %1254 = vmatprep.subr.msk.bf16.mxu0 %vm704_vm13, %v1391_v30  ;;  %v706_v7 = vsel %vm704_vm13, %v1391_v30, 0  ;;  %vm636_vm15 = vcmask 64512  }
  0x54   : > { %631 = vrot.lane.b32.xlu1 %v563_v11, %s1496_s28  ;;  %1231 = vmatpush3.bf16.msra.mxu0 %v706_v7  ;;  %vm640_vm3 = vcmask 130048   ;;  %vm644_vm4 = vcmask 195584   ;;  %vm648_vm6 = vcmask 261120   ;;  %vm652_vm7 = vcmask 326656  }
  0x55   : > { %1354 = vrot.lane.b32.xlu0 %v1353_v29, %s1496_s28  ;;  %vm656_vm9 = vcmask 392192   ;;  %vm697_vm10 = vcmask 457728   ;;  %v1497_v23 = vmov 0.0   ;;  %vm834_vm12 = vcmp.ge.s32.totalorder %v1625_v1, 3 }
  0x56   : > { %1236 = vmatprep.subr.bf16.mxu1 %v1497_v23 }
  0x57   : > { %1237 = vmatpush3.bf16.msra.mxu1 %v1392_v22 }
  0x58   : > { %1238 = vmatprep.subr.bf16.mxu1 %v1497_v23 }
  0x5b   : > { %1239 = vmatpush3.bf16.msra.mxu1 %v1393_v24 }
  0x5c   : > { %1240 = vmatprep.subr.bf16.mxu1 %v1497_v23 }
  0x5f   : > { %1241 = vmatpush3.bf16.msra.mxu1 %v1394_v25 }
  0x60   : > { %1242 = vmatprep.subr.bf16.mxu1 %v1497_v23 }
  0x63   : > { %1243 = vmatpush3.bf16.msra.mxu1 %v1395_v26 }
  0x64   : > { %1244 = vmatprep.subr.bf16.mxu1 %v1497_v23 }
  0xb2   : > { %v1335_v35 = vpop.permute.xlu1 %1334 }
  0xb3   : > { %v1330_v36 = vpop.permute.xlu0 %1329  ;;  %v1336_v45 = vunpack.i.l.bf16 %v1335_v35  ;;  %v1337_v46 = vunpack.i.h.bf16 %v1335_v35 }
  0xb4   : > { %v1331_v41 = vunpack.i.l.bf16 %v1330_v36  ;;  %v1332_v43 = vunpack.i.h.bf16 %v1330_v36 }
  0xb6   : > { %v584_v37 = vpop.permute.xlu1 %583  ;;  %v637_v47 = vsel %vm636_vm15, %v403_v33, %v1331_v41  ;;  %v638_v51 = vsel %vm636_vm15, %v404_v34, %v1332_v43 }
  0xb7   : > { %v572_v38 = vpop.permute.xlu0 %571  ;;  %v641_v57 = vsel %vm640_vm3, %v637_v47, %v1336_v45  ;;  %v642_v61 = vsel %vm640_vm3, %v638_v51, %v1337_v46 }
  0xb8   : > { %v639_v48 = vsel %vm636_vm15, %v405_v32, %v572_v38 }
  0xb9   : > { %v643_v56 = vsel %vm640_vm3, %v639_v48, %v584_v37 }
  0xba   : > { %v596_v39 = vpop.permute.xlu1 %595 }
  0xbb   : > { %v1340_v40 = vpop.permute.xlu0 %1339  ;;  %v647_v60 = vsel %vm644_vm4, %v643_v56, %v596_v39 }
  0xbc   : > { %v1341_v49 = vunpack.i.l.bf16 %v1340_v40  ;;  %v1342_v52 = vunpack.i.h.bf16 %v1340_v40 }
  0xbe   : > { %v608_v42 = vpop.permute.xlu1 %607  ;;  %v645_v62 = vsel %vm644_vm4, %v641_v57, %v1341_v49  ;;  %v646_v0 = vsel %vm644_vm4, %v642_v61, %v1342_v52 }
  0xbf   : > { %v1345_v44 = vpop.permute.xlu0 %1344  ;;  %v651_v3 = vsel %vm648_vm6, %v647_v60, %v608_v42 }
  0xc0   : > { %v1346_v53 = vunpack.i.l.bf16 %v1345_v44  ;;  %v1347_v55 = vunpack.i.h.bf16 %v1345_v44 }
  0xc2   : > { %v620_v50 = vpop.permute.xlu1 %619  ;;  %v649_v4 = vsel %vm648_vm6, %v645_v62, %v1346_v53  ;;  %v650_v8 = vsel %vm648_vm6, %v646_v0, %v1347_v55 }
  0xc3   : > { %v1350_v54 = vpop.permute.xlu0 %1349  ;;  %v655_v9 = vsel %vm652_vm7, %v651_v3, %v620_v50 }
  0xc4   : > { %v1352_v58 = vunpack.i.h.bf16 %v1350_v54  ;;  %v1351_v59 = vunpack.i.l.bf16 %v1350_v54 }
  0xc6   : > { %v632_v63 = vpop.permute.xlu1 %631  ;;  %v653_v16 = vsel %vm652_vm7, %v649_v4, %v1351_v59  ;;  %v654_v17 = vsel %vm652_vm7, %v650_v8, %v1352_v58 }
  0xc7   : > { %v1355_v6 = vpop.permute.xlu0 %1354  ;;  %v659_v15 = vsel %vm656_vm9, %v655_v9, %v632_v63 }
  0xc8   : > { %v1357_v13 = vunpack.i.h.bf16 %v1355_v6  ;;  %v1356_v14 = vunpack.i.l.bf16 %v1355_v6  ;;  %v661_v21 = vpack.c.bf16 %v659_v15, %v659_v15 }
  0xca   : > { %v657_v18 = vsel %vm656_vm9, %v653_v16, %v1356_v14  ;;  %v658_v19 = vsel %vm656_vm9, %v654_v17, %v1357_v13 }
  0xcb   : > { %v660_v20 = vpack.c.bf16 %v658_v19, %v657_v18 }
  0xcd   : > { %1232 = vmatprep.mubr.msk.bf16.mxu0 %vm697_vm10, %v660_v20 }
  0xce   : > { %1233 = vmatmul.mubr.msk.bf16.vlgmr.msra.gmra.mrb[0].mxu0 %vm697_vm10, %v661_v21 }
 0x1a1   : > { %v1234_v28 = vpop.f32.mrb[0].mxu0 }
 0x1a2   : > { %v1833_v11 = vadd.f32 %v1234_v28, %v1189_v27  ;;  %v742_v29 = vpop.f32.mrb[1].mxu0 }
 0x1a3   : > { %v1835_v30 = vadd.f32 %v1189_v27, %v742_v29  ;;  %v1235_v10 = vpop.f32.mrb[2].mxu0 }
 0x1a4   : > { %v1838_v31 = vmul.f32 0.70710677, %v1833_v11  ;;  %v745_v12 = vpop.f32.mrb[3].mxu0 }
 0x1a5   : > { %v1841_v32 = vmul.f32 0.70710677, %v1835_v30  ;;  %v1843_v33 = vadd.f32 %v1189_v27, %v745_v12 }
 0x1a6   : > { %v761_v34 = vand.u32 2147483647, %v1838_v31  ;;  %vm818_vm11 = vcmp.ge.f32.partialorder %v1838_v31, 0.0 }
 0x1a7   : > { %v759_v7 = vand.u32 2147483647, %v1841_v32  ;;  %v1848_v35 = vmul.f32 0.70710677, %v1843_v33  ;;  %vm816_vm14 = vcmp.ge.f32.partialorder %v1841_v32, 0.0  ;;  %v1396_v32 = vld [vmem:[%s1955_s6 + $0x20] sm:$0xff]  }
 0x1a8   : > { %v764_v36 = vmul.f32 0.3275911, %v761_v34  ;;  %v800_v43 = vsub.f32 0.0, %v761_v34  ;;  %1245 = vmatpush3.bf16.msra.mxu1 %v1396_v32 }
 0x1a9   : > { %v762_v37 = vmul.f32 0.3275911, %v759_v7  ;;  %v760_v38 = vand.u32 2147483647, %v1848_v35  ;;  %v798_v44 = vsub.f32 0.0, %v759_v7  ;;  %vm817_vm10 = vcmp.ge.f32.partialorder %v1848_v35, 0.0  ;;  %1246 = vmatprep.subr.bf16.mxu1 %v1497_v23 }
 0x1aa   : > { %v767_v39 = vadd.f32 1.0, %v764_v36  ;;  %v803_v46 = vmul.f32 %v800_v43, %v761_v34  ;;  %v838_v34 = vstv %s837_s15  ;;  %v1397_v35 = vld [vmem:[%s1955_s6 + $0x28] sm:$0xff]  }
 0x1ab   : > { %v765_v40 = vadd.f32 1.0, %v762_v37  ;;  %v763_v41 = vmul.f32 0.3275911, %v760_v38  ;;  %v799_v47 = vsub.f32 0.0, %v760_v38  ;;  %v801_v50 = vmul.f32 %v798_v44, %v759_v7 }
 0x1ac   : > { %1399 = vrcp.f32 %v767_v39  ;;  %v808_v54 = vmul.f32 1.442695, %v803_v46  ;;  %vm839_vm13 = vcmp.lt.s32.totalorder %v1625_v1, %v838_v34  ;;  %vm841_vm4 = vcmp.lt.s32.totalorder %v1645_v5, %v838_v34  ;;  %1247 = vmatpush3.bf16.msra.mxu1 %v1397_v35 }
 0x1ad   : > { %1401 = vrcp.f32 %v765_v40  ;;  %v766_v42 = vadd.f32 1.0, %v763_v41  ;;  %v802_v56 = vmul.f32 %v799_v47, %v760_v38  ;;  %v804_v58 = vmul.f32 1.442695, %v801_v50  ;;  %vm842_vm7 = vmand %vm834_vm12, %vm839_vm13  ;;  %1248 = vmatprep.subr.bf16.mxu1 %v1497_v23 }
 0x1ae   : > { %v827_v41 = vmul.f32 0.5, %v1833_v11  ;;  %v825_v44 = vmul.f32 0.5, %v1835_v30  ;;  %v826_v11 = vmul.f32 0.5, %v1843_v33  ;;  %vm857_vm12 = vcmp.lt.s32.totalorder %v1625_v1, 7 }
 0x1af   : > { %1403 = vrcp.f32 %v766_v42  ;;  %v806_v0 = vmul.f32 1.442695, %v802_v56 }
 0x1b0   : > { %1405 = vpow2.f32 %v808_v54 }
 0x1b1   : > { %1407 = vpow2.f32 %v804_v58 }
 0x1b2   : > { %1409 = vpow2.f32 %v806_v0 }
 0x1b6   : > { %v1400_v45 = vpop.eup %1399 }
 0x1b7   : > { %v1402_v48 = vpop.eup %1401  ;;  %v773_v49 = vmul.f32 1.0614054, %v1400_v45 }
 0x1b8   : > { %v771_v51 = vmul.f32 1.0614054, %v1402_v48 }
 0x1b9   : > { %v776_v52 = vadd.f32 -1.4531521, %v773_v49  ;;  %v1404_v53 = vpop.eup %1403 }
 0x1ba   : > { %v774_v55 = vadd.f32 -1.4531521, %v771_v51  ;;  %v772_v59 = vmul.f32 1.0614054, %v1404_v53  ;;  %v1406_v22 = vpop.eup %1405 }
 0x1bb   : > { %v779_v57 = vmul.f32 %v1400_v45, %v776_v52  ;;  %v1408_v25 = vpop.eup %1407 }
 0x1bc   : > { %v777_v60 = vmul.f32 %v1402_v48, %v774_v55  ;;  %v775_v62 = vadd.f32 -1.4531521, %v772_v59  ;;  %v1410_v12 = vpop.eup %1409 }
 0x1bd   : > { %v782_v61 = vadd.f32 1.4214138, %v779_v57 }
 0x1be   : > { %v780_v63 = vadd.f32 1.4214138, %v777_v60  ;;  %v778_v4 = vmul.f32 %v1404_v53, %v775_v62 }
 0x1bf   : > { %v785_v3 = vmul.f32 %v1400_v45, %v782_v61 }
 0x1c0   : > { %v783_v6 = vmul.f32 %v1402_v48, %v780_v63  ;;  %v781_v9 = vadd.f32 1.4214138, %v778_v4 }
 0x1c1   : > { %v788_v8 = vadd.f32 -0.28449672, %v785_v3 }
 0x1c2   : > { %v786_v13 = vadd.f32 -0.28449672, %v783_v6  ;;  %v784_v15 = vmul.f32 %v1404_v53, %v781_v9 }
 0x1c3   : > { %v791_v14 = vmul.f32 %v1400_v45, %v788_v8 }
 0x1c4   : > { %v789_v16 = vmul.f32 %v1402_v48, %v786_v13  ;;  %v787_v18 = vadd.f32 -0.28449672, %v784_v15  ;;  %v1398_v13 = vld [vmem:[%s1955_s6 + $0x30] sm:$0xff]  }
 0x1c5   : > { %v794_v17 = vadd.f32 0.2548296, %v791_v14  ;;  %1249 = vmatpush3.bf16.msra.mxu1 %v1398_v13 }
 0x1c6   : > { %v792_v19 = vadd.f32 0.2548296, %v789_v16  ;;  %v790_v21 = vmul.f32 %v1404_v53, %v787_v18 }
 0x1c7   : > { %v797_v20 = vmul.f32 %v1400_v45, %v794_v17 }
 0x1c8   : > { %v795_v24 = vmul.f32 %v1402_v48, %v792_v19  ;;  %v793_v27 = vadd.f32 0.2548296, %v790_v21 }
 0x1c9   : > { %v812_v26 = vmul.f32 %v1406_v22, %v797_v20 }
 0x1ca   : > { %v810_v28 = vmul.f32 %v1408_v25, %v795_v24  ;;  %v796_v10 = vmul.f32 %v1404_v53, %v793_v27 }
 0x1cb   : > { %v815_v29 = vsub.f32 1.0, %v812_v26 }
 0x1cc   : > { %v813_v7 = vsub.f32 1.0, %v810_v28  ;;  %v811_v37 = vmul.f32 %v1410_v12, %v796_v10 }
 0x1cd   : > { %v821_v36 = vsub.f32 0.0, %v815_v29 }
 0x1ce   : > { %v819_v38 = vsub.f32 0.0, %v813_v7  ;;  %v814_v40 = vsub.f32 1.0, %v811_v37 }
 0x1cf   : > { %v824_v39 = vsel %vm818_vm11, %v815_v29, %v821_v36  ;;  %vm840_vm11 = vcmp.lt.s32.totalorder %v1628_v2, %v838_v34 }
 0x1d0   : > { %v830_v42 = vadd.f32 1.0, %v824_v39  ;;  %v822_v43 = vsel %vm816_vm14, %v813_v7, %v819_v38  ;;  %v820_v46 = vsub.f32 0.0, %v814_v40 }
 0x1d1   : > { %v828_v45 = vadd.f32 1.0, %v822_v43 }
 0x1d2   : > { %v833_v31 = vmul.f32 %v830_v42, %v827_v41  ;;  %v823_v48 = vsel %vm817_vm10, %v814_v40, %v820_v46 }
 0x1d3   : > { %v831_v47 = vmul.f32 %v828_v45, %v825_v44  ;;  %v829_v50 = vadd.f32 1.0, %v823_v48 }
 0x1d4   : > { %v853_v49 = vsel %vm841_vm4, %v833_v31, 0.0 }
 0x1d5   : > { %v1864_v51 = vsel %vm842_vm7, %v831_v47, 0.0  ;;  %v832_v5 = vmul.f32 %v829_v50, %v826_v11  ;;  %v862_v30 = vrot.slane %v853_v49, 2  ;;  %v856_v54 = vrot.slane %v853_v49, 1 }
 0x1d6   : > { %v860_v53 = vrot.slane %v1864_v51, 2  ;;  %v854_v33 = vrot.slane %v1864_v51, 1  ;;  %v870_v58 = vrot.slane %v1864_v51, 4  ;;  %v872_v59 = vrot.slane %v853_v49, 4 }
 0x1d7   : > { %v852_v52 = vsel %vm840_vm11, %v832_v5, 0.0  ;;  %v865_v60 = vrot.slane %v1864_v51, 3  ;;  %v867_v61 = vrot.slane %v853_v49, 3  ;;  %v880_v18 = vrot.slane %v1864_v51, 6 }
 0x1d8   : > { %v861_v55 = vrot.slane %v852_v52, 2  ;;  %v855_v56 = vrot.slane %v852_v52, 1  ;;  %v871_v2 = vrot.slane %v852_v52, 4  ;;  %v866_v57 = vrot.slane %v852_v52, 3 }
 0x1d9   : > { %v881_v8 = vrot.slane %v852_v52, 6  ;;  %v876_v9 = vrot.slane %v852_v52, 5  ;;  %v882_v19 = vrot.slane %v853_v49, 6  ;;  %v875_v20 = vrot.slane %v1864_v51, 5 }
 0x1da   : > { %v863_v62 = vsel %vm380_vm8, %v861_v55, %v862_v30  ;;  %v864_v63 = vsel %vm380_vm8, %v860_v53, %v861_v55  ;;  %v858_v0 = vsel %vm857_vm12, %v855_v56, %v856_v54  ;;  %v859_v3 = vsel %vm857_vm12, %v854_v33, %v855_v56  ;;  %v1196_v55 = vld [vmem:[%s1956_s7] ss:$0 sm:$0xff] }
 0x1db   : > { %v1363_v4 = vpack.i.bf16 %v863_v62, %v864_v63  ;;  %v1358_v6 = vpack.i.bf16 %v858_v0, %v859_v3  ;;  %v873_v14 = vsel %vm437_vm0, %v871_v2, %v872_v59  ;;  %v874_v15 = vsel %vm437_vm0, %v870_v58, %v871_v2  ;;  %v1062_v62 = vld [vmem:[%s1636_s17 + $0x8] sm:$0xff] (!%p1205_p5) }
 0x1dc   : > { %v868_v16 = vsel %vm409_vm1, %v866_v57, %v867_v61  ;;  %v869_v17 = vsel %vm409_vm1, %v865_v60, %v866_v57  ;;  %v877_v21 = vrot.slane %v853_v49, 5  ;;  %v1373_v22 = vpack.i.bf16 %v873_v14, %v874_v15  ;;  %v1061_v61 = vld [vmem:[%s1636_s17] sm:$0xff] (!%p1205_p5)  ;;  %1064 = vst.msk [vmem:[%s1641_s20 + $0x8] sm:$0xff] (!%p1205_p5), %vm636_vm15, %v1062_v62 }
 0x1dd   : > { %1364 = vrot.lane.b32.xlu1 %v1363_v4, %s1494_s23  ;;  %1359 = vrot.lane.b32.xlu0 %v1358_v6, %s1491_s13  ;;  %v1368_v24 = vpack.i.bf16 %v868_v16, %v869_v17  ;;  %vm1498_vm0 = vmmov 0   ;;  %v883_v25 = vsel %vm493_vm5, %v881_v8, %v882_v19  ;;  %v884_v26 = vsel %vm493_vm5, %v880_v18, %v881_v8  ;;  %s1499_s13 = smov 64   ;;  %s1500_s23 = smov 96  }
 0x1de   : > { %1250 = vmatprep.mubr.msk.bf16.mxu1 %vm1498_vm0, %v1497_v23  ;;  %v878_v27 = vsel %vm465_vm2, %v876_v9, %v877_v21  ;;  %v879_v28 = vsel %vm465_vm2, %v875_v20, %v876_v9  ;;  %v1383_v29 = vpack.i.bf16 %v883_v25, %v884_v26  ;;  %vm939_vm1 = vcmask 523264   ;;  %1063 = vst.msk [vmem:[%s1641_s20] sm:$0xff] (!%p1205_p5), %vm636_vm15, %v1061_v61 }
 0x1df   : > { %v1378_v10 = vpack.i.bf16 %v878_v27, %v879_v28  ;;  %vm942_vm2 = vcmask 654336   ;;  %vm945_vm5 = vcmask 785408   ;;  %vm1012_vm8 = vcmask 916480  }
 0x1e1   : > { %1374 = vrot.lane.b32.xlu1 %v1373_v22, %s1499_s13  ;;  %1369 = vrot.lane.b32.xlu0 %v1368_v24, %s1496_s28 }
 0x1e5   : > { %1384 = vrot.lane.b32.xlu1 %v1383_v29, %s1500_s23  ;;  %1379 = vrot.lane.b32.xlu0 %v1378_v10, %s1501_s25 }
 0x24f   : > { %v1365_v23 = vpop.permute.xlu1 %1364  ;;  %v1360_v12 = vpop.permute.xlu0 %1359 }
 0x250   : > { %v1362_v34 = vunpack.i.h.bf16 %v1360_v12  ;;  %v1361_v7 = vunpack.i.l.bf16 %v1360_v12  ;;  %v1367_v36 = vunpack.i.h.bf16 %v1365_v23  ;;  %v1366_v37 = vunpack.i.l.bf16 %v1365_v23 }
 0x252   : > { %v934_v38 = vsel %vm640_vm3, %v852_v52, %v1362_v34  ;;  %v933_v1 = vsel %vm640_vm3, %v1864_v51, %v1361_v7 }
 0x253   : > { %v1375_v39 = vpop.permute.xlu1 %1374  ;;  %v1370_v40 = vpop.permute.xlu0 %1369  ;;  %v935_v45 = vsel %vm648_vm6, %v933_v1, %v1366_v37  ;;  %v936_v46 = vsel %vm648_vm6, %v934_v38, %v1367_v36 }
 0x254   : > { %v1372_v41 = vunpack.i.h.bf16 %v1370_v40  ;;  %v1371_v42 = vunpack.i.l.bf16 %v1370_v40  ;;  %v1377_v43 = vunpack.i.h.bf16 %v1375_v39  ;;  %v1376_v44 = vunpack.i.l.bf16 %v1375_v39 }
 0x256   : > { %v937_v31 = vsel %vm656_vm9, %v935_v45, %v1371_v42  ;;  %v938_v47 = vsel %vm656_vm9, %v936_v46, %v1372_v41 }
 0x257   : > { %v1385_v48 = vpop.permute.xlu1 %1384  ;;  %v1380_v32 = vpop.permute.xlu0 %1379  ;;  %v940_v5 = vsel %vm939_vm1, %v937_v31, %v1376_v44  ;;  %v941_v30 = vsel %vm939_vm1, %v938_v47, %v1377_v43 }
 0x258   : > { %v1387_v49 = vunpack.i.h.bf16 %v1385_v48  ;;  %v1386_v11 = vunpack.i.l.bf16 %v1385_v48  ;;  %v1382_v50 = vunpack.i.h.bf16 %v1380_v32  ;;  %v1381_v51 = vunpack.i.l.bf16 %v1380_v32 }
 0x25a   : > { %v943_v35 = vsel %vm942_vm2, %v940_v5, %v1381_v51  ;;  %v944_v52 = vsel %vm942_vm2, %v941_v30, %v1382_v50 }
 0x25b   : > { %v946_v53 = vsel %vm945_vm5, %v943_v35, %v1386_v11  ;;  %v947_v33 = vsel %vm945_vm5, %v944_v52, %v1387_v49 }
 0x25c   : > { %v948_v54 = vpack.c.bf16 %v947_v33, %v946_v53 }
 0x25e   : > { %1251 = vmatmul.mubr.msk.bf16.vlgmr.msra.gmra.mrb[0].mxu1 %vm1012_vm8, %v948_v54 }
 0x32e   : > { %1060 = sbr.rel (%p1205_p5) target bundleno = 821 (0x335), region = 64 }
 0x331   : > { %v1050_v56 = vpop.f32.mrb[0].mxu1 }
 0x332   : > { %v1051_v2 = vadd.f32 %v1196_v55, %v1050_v56  ;;  %v1252_v57 = vpop.f32.mrb[1].mxu1 }
 0x333   : > { %v1053_v58 = vpop.f32.mrb[2].mxu1 }
 0x334   : > { %v1054_v59 = vadd.f32 %v1196_v55, %v1053_v58  ;;  %v1253_v60 = vpop.f32.mrb[3].mxu1 }
 0x335 PF: > { %v1065_v63 = vld [vmem:[%s1641_s20] sm:$0xff]  ;;  %v1067_v0 = vstv %s1715_s18  ;;  %v1066_v3 = vld [vmem:[%s1641_s20 + $0x8] sm:$0xff] }
 0x336   : > { %v1068_v4 = vmul.f32 %v1067_v0, %v1051_v2  ;;  %v1069_v6 = vmul.f32 %v1067_v0, %v1054_v59 }
 0x338   : > { %v1070_v8 = vadd.f32 %v1068_v4, %v1065_v63  ;;  %v1071_v9 = vadd.f32 %v1069_v6, %v1066_v3 }
 0x33a   : > { %1072 = vst.msk [vmem:[%s1641_s20] sm:$0xff] %vm636_vm15, %v1070_v8  ;;  %1073 = vst.msk [vmem:[%s1641_s20 + $0x8] sm:$0xff] %vm636_vm15, %v1071_v9 }
 0x33b PF: > { %s20_s9 = sadd.s32 1, %s1487_s9   ;;  %s1970_s27 = smov %s1479_s29 }
 0x33c   : > { %p17_p7 = scmp.ge.s32.totalorder %s20_s9, 8   ;;  %s1971_s28 = smov %s1483_s30 }
 0x33d   : > { %s1972_s29 = smov %s1975_s11  ;;  %s1973_s30 = smov %s1979_s12 }
 0x33e   :  { %19 = sbr.rel (!%p17_p7) target bundleno = 4 (0x4), region = 98 }
 0x345   :  { %1095 = vsyncpa [#allocation3], 1 }
 0x346   :  { %1097 = vsyncpa [#allocation3 + $0x1], 1 }
 0x347   :  { %1098 = vsyncpa [#allocation5], 1 }

</bundles_post_ra>
